<compile_context>
chip_gen: v7x
topology: tpu7x:2x2x1
jax: 0.10.0
libtpu: 0.0.40
codegen_flags: <defaults>
</compile_context>

<pallas_src>
import functools

import jax
import jax.numpy as jnp
from jax.experimental import pallas as pl
from jax.experimental.pallas import tpu as pltpu


def _round_up(x, m):
    return ((x + m - 1) // m) * m


# ------------------------------- kernels -------------------------------------


def _rmsnorm_kernel(x_ref, w_ref, o_ref, *, eps):
    # x_ref: (TM, H) row tile, w_ref: (1, H) f32 scale, o_ref: (TM, H) output.
    x_f32 = x_ref[...].astype(jnp.float32)
    variance = jnp.mean(x_f32 * x_f32, axis=-1, keepdims=True)
    inv_rms = jax.lax.rsqrt(variance + eps)
    # Torch-exact rounding: downcast the normalized activation to the input
    # dtype, then multiply by the f32 weight (no-ops for f32 inputs).
    normed = (x_f32 * inv_rms).astype(x_ref.dtype)
    out_f32 = normed.astype(jnp.float32) * w_ref[...]
    o_ref[...] = out_f32.astype(o_ref.dtype)


def _rmsnorm_hidden_z_kernel(x_ref, w_eff_ref, keep_scaled_ref, o_ref, *, eps):
    # Pruning-mask path.  Grid-invariant work is hoisted into the wrapper:
    #   keep_scaled = (hidden_z != 0) / count_kept     (1, H)
    #   w_eff       = weight * hidden_z                (1, H)
    # so each tile does one masked row reduction and one (TM, H) scale.
    x_f32 = x_ref[...].astype(jnp.float32)
    variance = jnp.sum(x_f32 * x_f32 * keep_scaled_ref[...], axis=-1, keepdims=True)
    inv_rms = jax.lax.rsqrt(variance + eps)
    normed = (x_f32 * inv_rms).astype(x_ref.dtype)
    o_ref[...] = (normed.astype(jnp.float32) * w_eff_ref[...]).astype(o_ref.dtype)


# ------------------------------- tiling --------------------------------------


def _vmem_config():
    """Return (tiling_budget_bytes, vmem_limit_cap_bytes) for the local chip."""
    try:
        cap = int(getattr(pltpu.get_tpu_info(), "vmem_capacity_bytes", 0))
    except Exception:
        cap = 0
    if cap <= 0:
        # Unknown generation: conservative config that is safe everywhere.
        return 32 << 20, 48 << 20
    if cap <= (64 << 20):
        # v7x-class: 64 MiB per TensorCore; leave headroom for Mosaic scratch.
        return 24 << 20, 40 << 20
    # v5e / v6e: 128 MiB physical VMEM per core.
    return 64 << 20, 96 << 20


def _per_row_bytes(hidden, itemsize):
    # in + out tiles each double-buffered (4x activation dtype) plus ~2 live
    # f32 intermediates in the body.
    return hidden * (4 * itemsize + 2 * 4)


def _pick_block_rows(rows, hidden, itemsize, vmem_budget_bytes, max_block_rows=4096):
    """Row-tile size for a memory-bound rowwise kernel.

    Multiples of 32 rows satisfy sublane packing for f32 / bf16 / int8.
    Never returns a single-block grid when rows >= 64 so the "parallel" grid
    axis can be sharded across v7x's two TensorCores.
    """
    budget_rows = max(32, vmem_budget_bytes // max(_per_row_bytes(hidden, itemsize), 1))
    br = max(32, (min(max_block_rows, budget_rows) // 32) * 32)
    if rows < 64:
        # Tiny input: one full-array block (always a legal block shape).
        return rows
    if rows <= br:
        # Whole tensor would fit one block: split into (at least) two blocks
        # so both v7x TensorCores get work.
        return min(br, _round_up(pl.cdiv(rows, 2), 32))
    return int(br)


# ------------------------------- wrapper -------------------------------------


def qwen2_rmsnorm(hidden_states, weight, hidden_z=None, eps=1e-6, block_rows=None):
    """RMSNorm over the last axis of `hidden_states` using a Pallas TPU kernel.

    If `block_rows` is given explicitly it must be a multiple of 8 (sublane)
    or equal to the flattened row count, and small enough to fit the
    per-generation VMEM cap.
    """
    orig_shape = hidden_states.shape
    hidden = orig_shape[-1]
    x2d = hidden_states.reshape(-1, hidden)
    rows = x2d.shape[0]
    itemsize = jnp.dtype(hidden_states.dtype).itemsize

    vmem_budget, vmem_cap = _vmem_config()
    if block_rows is None:
        block_rows = _pick_block_rows(rows, hidden, itemsize, vmem_budget)
    else:
        block_rows = int(block_rows)
        if block_rows != rows and block_rows % 8 != 0:
            raise ValueError("block_rows must be a multiple of 8 or equal to the row count")

    needed = block_rows * _per_row_bytes(hidden, itemsize) + (8 << 20)
    if needed > vmem_cap:
        raise ValueError(
            f"block_rows={block_rows} needs ~{needed >> 20} MiB VMEM but this TPU "
            f"generation is capped at {vmem_cap >> 20} MiB; use a smaller block_rows.")
    vmem_limit = int(min(vmem_cap, max(32 << 20, needed)))

    grid = (pl.cdiv(rows, block_rows),)

    # Advisory scheduling hint: the op is pure HBM streaming.
    cost = pl.CostEstimate(
        flops=4 * rows * hidden,
        transcendentals=rows,
        bytes_accessed=2 * rows * hidden * itemsize
        + hidden * jnp.dtype(weight.dtype).itemsize,
    )

    compiler_params = pltpu.CompilerParams(
        dimension_semantics=("parallel",),
        vmem_limit_bytes=vmem_limit,
    )

    row_spec = pl.BlockSpec((block_rows, hidden), lambda i: (i, 0))
    vec_spec = pl.BlockSpec((1, hidden), lambda i: (0, 0))

    if hidden_z is None:
        w2d = weight.reshape(1, hidden).astype(jnp.float32)
        out2d = pl.pallas_call(
            functools.partial(_rmsnorm_kernel, eps=eps),
            out_shape=jax.ShapeDtypeStruct((rows, hidden), hidden_states.dtype),
            grid_spec=pltpu.PrefetchScalarGridSpec(
                num_scalar_prefetch=0,
                grid=grid,
                in_specs=[row_spec, vec_spec],
                out_specs=row_spec,
            ),
            compiler_params=compiler_params,
            cost_estimate=cost,
        )(x2d, w2d)
    else:
        # Hoist all grid-invariant pruning-mask work out of the kernel.
        hz = hidden_z.reshape(1, hidden).astype(jnp.float32)
        keep = (hz != 0.0).astype(jnp.float32)
        # TODO(synk): an all-zero hidden_z yields NaN in torch (empty
        # index_select); here we guard with max(count, 1) instead.
        keep_scaled = keep / jnp.maximum(jnp.sum(keep), 1.0)
        w_eff = weight.reshape(1, hidden).astype(jnp.float32) * hz
        out2d = pl.pallas_call(
            functools.partial(_rmsnorm_hidden_z_kernel, eps=eps),
            out_shape=jax.ShapeDtypeStruct((rows, hidden), hidden_states.dtype),
            grid_spec=pltpu.PrefetchScalarGridSpec(
                num_scalar_prefetch=0,
                grid=grid,
                in_specs=[row_spec, vec_spec, vec_spec],
                out_specs=row_spec,
            ),
            compiler_params=compiler_params,
            cost_estimate=cost,
        )(x2d, w_eff, keep_scaled)

    return out2d.reshape(orig_shape)


# ------------------------------ reference ------------------------------------


def _reference_rmsnorm(hidden_states, weight, eps=1e-6, hidden_z=None):
    input_dtype = hidden_states.dtype
    x = hidden_states.astype(jnp.float32)
    if hidden_z is not None:
        keep = (hidden_z != 0).astype(jnp.float32)
        count = jnp.maximum(jnp.sum(keep), 1.0)
        variance = jnp.sum(x * x * keep, axis=-1, keepdims=True) / count
    else:
        variance = jnp.mean(x * x, axis=-1, keepdims=True)
    normed = x * jax.lax.rsqrt(variance + eps)
    out = weight.astype(jnp.float32) * normed.astype(input_dtype).astype(jnp.float32)
    if hidden_z is not None:
        out = out * hidden_z.astype(jnp.float32)
    return out.astype(input_dtype)


if __name__ == "__main__":
    key = jax.random.PRNGKey(0)
    eps = 1e-6
    batch, seq, hidden = 2, 8, 32
    k_x, k_x2, k_x3, k_z = jax.random.split(key, 4)

    # Parameter init matches nn.Parameter(torch.ones(hidden_size)).
    weight = jnp.ones((hidden,), dtype=jnp.float32)

    # 1) Main path (hidden_z=None), tiny input -> single full block.
    x = jax.random.normal(k_x, (batch, seq, hidden), dtype=jnp.float32)
    out = jax.block_until_ready(qwen2_rmsnorm(x, weight, eps=eps))
    ref = _reference_rmsnorm(x, weight, eps=eps)
    assert out.shape == x.shape and out.dtype == x.dtype
    assert jnp.allclose(out, ref, atol=1e-5, rtol=1e-5), "mismatch vs reference"

    # 2) rows >= 64: exercises the automatic >=2-block row split (v7x dual-core).
    x2 = jax.random.normal(k_x2, (4, 32, hidden), dtype=jnp.float32)
    out2 = jax.block_until_ready(qwen2_rmsnorm(x2, weight, eps=eps))
    ref2 = _reference_rmsnorm(x2, weight, eps=eps)
    assert jnp.allclose(out2, ref2, atol=1e-5, rtol=1e-5), "split-grid mismatch"

    # 3) Edge-block path: rows (3*37=111) not a multiple of block_rows (32);
    #    exercises masked edge-block stores (no host-side padding).
    x3 = jax.random.normal(k_x3, (3, 37, hidden), dtype=jnp.float32)
    out3 = jax.block_until_ready(qwen2_rmsnorm(x3, weight, eps=eps, block_rows=32))
    ref3 = _reference_rmsnorm(x3, weight, eps=eps)
    assert jnp.allclose(out3, ref3, atol=1e-5, rtol=1e-5), "edge-block mismatch"

    # 4) hidden_z pruning-mask path (non-binary gate values).
    hidden_z = (jax.random.uniform(k_z, (hidden,)) > 0.25).astype(jnp.float32) * 1.5
    out4 = jax.block_until_ready(qwen2_rmsnorm(x, weight, hidden_z=hidden_z, eps=eps))
    ref4 = _reference_rmsnorm(x, weight, eps=eps, hidden_z=hidden_z)
    assert jnp.allclose(out4, ref4, atol=1e-5, rtol=1e-5), "hidden_z mismatch"

    print("KERNEL_OK")
</pallas_src>

<mosaic_0001>
module attributes {stable_mosaic.version = 11 : i64} {
  func.func @_rmsnorm_kernel(%arg0: i32, %arg1: memref<16x32xf32, #tpu.memory_space<vmem>>, %arg2: memref<1x32xf32, #tpu.memory_space<vmem>>, %arg3: memref<16x32xf32, #tpu.memory_space<vmem>>) attributes {dimension_semantics = [#tpu.dimension_semantics<parallel>], iteration_bounds = array<i64: 1>, scalar_prefetch = 0 : i64, scratch_operands = 0 : i64, tpu.core_type = #tpu.core_type<tc>, window_params = [{transform_indices = @transform_0, window_bounds = array<i64: 16, 32>}, {pipeline_mode = #tpu.pipeline_mode<synchronous>, transform_indices = @transform_1, window_bounds = array<i64: 1, 32>}, {transform_indices = @transform_2, window_bounds = array<i64: 16, 32>}]} {
    %c0 = arith.constant 0 : index
    %c0_0 = arith.constant 0 : index
    %0 = vector.load %arg1[%c0, %c0_0] : memref<16x32xf32, #tpu.memory_space<vmem>>, vector<16x32xf32>
    %1 = arith.mulf %0, %0 : vector<16x32xf32>
    %cst = arith.constant dense<0.000000e+00> : vector<16xf32>
    %2 = vector.multi_reduction <add>, %1, %cst [1] : vector<16x32xf32> to vector<16xf32>
    %3 = vector.shape_cast %2 : vector<16xf32> to vector<16x1xf32>
    %cst_1 = arith.constant 3.200000e+01 : f32
    %4 = vector.broadcast %cst_1 : f32 to vector<16x1xf32>
    %5 = arith.divf %3, %4 : vector<16x1xf32>
    %cst_2 = arith.constant 9.99999997E-7 : f32
    %6 = vector.broadcast %cst_2 : f32 to vector<16x1xf32>
    %7 = arith.addf %5, %6 : vector<16x1xf32>
    %8 = math.rsqrt %7 : vector<16x1xf32>
    %9 = vector.broadcast %8 : vector<16x1xf32> to vector<16x32xf32>
    %10 = arith.mulf %0, %9 : vector<16x32xf32>
    %c0_3 = arith.constant 0 : index
    %c0_4 = arith.constant 0 : index
    %11 = vector.load %arg2[%c0_3, %c0_4] : memref<1x32xf32, #tpu.memory_space<vmem>>, vector<1x32xf32>
    %12 = vector.broadcast %11 : vector<1x32xf32> to vector<16x32xf32>
    %13 = arith.mulf %10, %12 : vector<16x32xf32>
    %c0_5 = arith.constant 0 : index
    %c0_6 = arith.constant 0 : index
    %14 = vector.load %arg3[%c0_5, %c0_6] : memref<16x32xf32, #tpu.memory_space<vmem>>, vector<16x32xf32>
    tpu.vector_store %arg3[%c0_5, %c0_6], %13 {strides = array<i32>} : memref<16x32xf32, #tpu.memory_space<vmem>>, vector<16x32xf32>,
    return
  }
  func.func @transform_0(%arg0: i32) -> (i32, i32) {
    %c0_i32 = arith.constant 0 : i32
    %c0_i32_0 = arith.constant 0 : i32
    return %arg0, %c0_i32 : i32, i32
  }
  func.func @transform_1(%arg0: i32) -> (i32, i32) {
    %c0_i32 = arith.constant 0 : i32
    %c0_i32_0 = arith.constant 0 : i32
    %c0_i32_1 = arith.constant 0 : i32
    return %c0_i32, %c0_i32_0 : i32, i32
  }
  func.func @transform_2(%arg0: i32) -> (i32, i32) {
    %c0_i32 = arith.constant 0 : i32
    %c0_i32_0 = arith.constant 0 : i32
    return %arg0, %c0_i32 : i32, i32
  }
}

</mosaic_0001>

<bundles_post_ra>
// kernel: tpu_custom_call.1
= control target key start
LH: loop header
LB: loop body
LE: loop exit
PB: predicated region body
PF: predicated region fallthrough
CT: control target
= control target key end

     0   :  { %7 = vsyncpa [#allocation3], 0  ;;  %s187_s0 = inlined_call_operand.hbm [shape: f32[16,32], index: 0, kind: input, shape index: {}]   ;;  %s188_s1 = inlined_call_operand.vmem [shape: f32[1,32], index: 1, kind: input, shape index: {}]   ;;  %s189_s2 = inlined_call_operand.hbm [shape: f32[16,32], index: 2, kind: output, shape index: {}]  }
   0x1   :  { %8 = vsyncpa [#allocation4], 0  ;;  %s131_s9 = smov [#allocation2]   ;;  %s83_s13 = scalar_lea.hbm %s187_s0, 256 }
   0x2   :  { %s14_s10 = sshll.u32 %s131_s9, 4  ;;  %p84_p0 = scmp.ne.s32.totalorder %s187_s0, %s83_s13  ;;  %s15_s10 = int_to_ptr.vmem [resolvable:$true] %s14_s10 }
   0x3   :  { %p87_p1 = scmp.lt.u32.totalorder %s83_s13, %s187_s0 }
   0x5   :  { %p89_p2 = pnand %p87_p1, %p84_p0 }
   0x7   :  { %92 = shalt.err (!%p89_p2)
}
   0x8   :  { %s93_s18 = scalar_lea.vmem %s15_s10, 256  ;;  %p98_p4 = scmp.lt.s32.totalorder %s15_s10, %s15_s10 }
   0x9   :  { %p94_p3 = scmp.ne.s32.totalorder %s15_s10, %s93_s18  ;;  %p99_p5 = scmp.lt.s32.totalorder %s93_s18, %s93_s18 }
   0xb   :  { %p100_p6 = por %p99_p5, %p98_p4 }
   0xd   :  { %p101_p7 = pnand %p100_p6, %p94_p3 }
   0xf   :  { %104 = shalt.err (!%p101_p7)
}
  0x10   :  { %s132_s19 = smov 128   ;;  %s133_s20 = smov 8  }
  0x11   :  { %20 = dma.hbm_to_vmem [thread:$0]  %s187_s0, 256, %s15_s10, [#allocation3], %s132_s19, %s132_s19, %s133_s20  }
  0x12   :  { %127 = dma.done.wait [#allocation3], 256  }
  0x13   :  { %128 = vsyncadd [#allocation3], 4294967040  ;;  %v26_v0 = vld [vmem:[#allocation2] sm:$0xff]  ;;  %vm30_vm0 = vcmask 261120   ;;  %v27_v1 = vld [vmem:[#allocation2 + $0x8] sm:$0xff]  ;;  %s134_s24 = smov [#allocation5]  }
  0x14   :  { %v28_v2 = vmul.f32 %v26_v0, %v26_v0  ;;  %v29_v3 = vmul.f32 %v27_v1, %v27_v1  ;;  %v74_v13 = vld [vmem:[%s188_s1] ss:$0 sm:$0xff]  ;;  %s62_s25 = sshll.u32 %s134_s24, 4  ;;  %s63_s25 = int_to_ptr.vmem [resolvable:$true] %s62_s25 }
  0x15   :  { %s105_s26 = scalar_lea.vmem %s63_s25, 256  ;;  %p110_p9 = scmp.lt.s32.totalorder %s63_s25, %s63_s25 }
  0x16   :  { %v31_v4 = vsel %vm30_vm0, %v28_v2, 0.0  ;;  %v34_v5 = vsel %vm30_vm0, %v29_v3, 0.0  ;;  %p106_p8 = scmp.ne.s32.totalorder %s63_s25, %s105_s26  ;;  %p111_p10 = scmp.lt.s32.totalorder %s105_s26, %s105_s26 }
  0x17   :  { %32 = vadd.xlane.f32.xlu0 %v31_v4 }
  0x18   :  { %p112_p11 = por %p111_p10, %p110_p9 }
  0x1a   :  { %p113_p12 = pnand %p112_p11, %p106_p8 }
  0x1b   :  { %35 = vadd.xlane.f32.xlu0 %v34_v5 }
  0xa4   :  { %v33_v6 = vpop.xlane.xlu0 %32 }
  0xa5   :  { %v38_v7 = vmul.f32 0.03125, %v33_v6 }
  0xa7   :  { %v40_v8 = vadd.f32 1e-06, %v38_v7 }
  0xa8   :  { %v36_v9 = vpop.xlane.xlu0 %35 }
  0xa9   :  { %79 = vrsqrt.f32 %v40_v8  ;;  %v39_v10 = vmul.f32 0.03125, %v36_v9 }
  0xab   :  { %v41_v11 = vadd.f32 1e-06, %v39_v10 }
  0xad   :  { %81 = vrsqrt.f32 %v41_v11 }
  0xb3   :  { %v80_v12 = vpop.eup %79 }
  0xb4   :  { %v44_v14 = vmul.f32 %v80_v12, %v26_v0 }
  0xb6   :  { %v53_v15 = vmul.f32 %v74_v13, %v44_v14 }
  0xb7   :  { %v82_v16 = vpop.eup %81 }
  0xb8   :  { %v45_v17 = vmul.f32 %v82_v16, %v27_v1  ;;  %55 = vst.msk [vmem:[#allocation5] sm:$0xff] %vm30_vm0, %v53_v15 }
  0xba   :  { %v54_v18 = vmul.f32 %v74_v13, %v45_v17 }
  0xbc   :  { %56 = vst.msk [vmem:[#allocation5 + $0x8] sm:$0xff] %vm30_vm0, %v54_v18 }
  0xbd   :  { %116 = shalt.err (!%p113_p12)
}
  0xbe   :  { %s117_s28 = scalar_lea.hbm %s189_s2, 256 }
  0xbf   :  { %p118_p13 = scmp.ne.s32.totalorder %s189_s2, %s117_s28  ;;  %p121_p0 = scmp.lt.u32.totalorder %s117_s28, %s189_s2 }
  0xc1   :  { %p123_p1 = pnand %p121_p0, %p118_p13 }
  0xc3   :  { %126 = shalt.err (!%p123_p1)
}
  0xc4   :  { %68 = dma.vmem_to_hbm [thread:$0]  %s63_s25, 256, %s189_s2, [#allocation4], %s132_s19, %s132_s19, %s133_s20  }
  0xc5   :  { %129 = dma.done.wait [#allocation4], 256  }
  0xc6   :  { %130 = vsyncadd [#allocation4], 4294967040 }
  0xc7   :  { %72 = vsyncpa [#allocation3], 1 }
  0xc8   :  { %73 = vsyncpa [#allocation4], 1 }

</bundles_post_ra>
